<compile_context>
chip_gen: v5e
topology: v5e:2x2
jax: 0.10.0
libtpu: 0.0.40
codegen_flags: <defaults>
</compile_context>

<pallas_src>
import jax
import jax.numpy as jnp
from jax import lax
from jax.experimental import pallas as pl
from jax.experimental.pallas import tpu as pltpu

# bf16 matmul operands + f32 accumulation: canonical MXU path on v5e/v6e/v7x.
MATMUL_DTYPE = jnp.bfloat16


def _cdiv(a, b):
    return -(-a // b)


def _round_up(x, m):
    return ((x + m - 1) // m) * m


def _tpu_budget():
    """(vmem_limit_bytes, max row tile) chosen per TPU generation."""
    try:
        cap = pltpu.get_tpu_info().vmem_capacity_bytes
    except Exception:  # API drift / interpret mode -> conservative defaults
        cap = None
    if cap is not None and cap > 96 * 1024 * 1024:
        # v5e / v6e: 128 MiB physical VMEM, single TensorCore -> big tiles to
        # amortize the ~0.35us/grid-step overhead on these bandwidth-bound ops.
        return 100 * 1024 * 1024, 2048
    # v7x-class (64 MiB physical) or unknown: stay conservative; the >=2-step
    # row grid lets dimension_semantics='parallel' shard across its 2 TCs.
    return 48 * 1024 * 1024, 1024


def _choose_tile(n_rows, max_rows, min_steps=2):
    """Row tile: multiple of 8, <= max_rows, and (when the problem allows it)
    at least `min_steps` grid steps so both v7x TensorCores get work."""
    n8 = _round_up(max(n_rows, 1), 8)
    tile = min(max_rows, n8)
    while tile > 8 and _cdiv(n_rows, tile) < min_steps:
        tile = _round_up(tile // 2, 8)
    return tile


# ----------------------------------------------------------------------------
# Pallas kernel 1: 1x1 Conv2d (input_proj) == pointwise channel matmul + bias
#   rows = flattened batch*H*W positions (NHWC), last dim = channels.
#   x/w are bf16 in HBM; accumulation in f32; bias f32; output bf16.
# ----------------------------------------------------------------------------
def _conv1x1_kernel(x_ref, w_ref, b_ref, o_ref):
    # x_ref: (TN, C) bf16, w_ref: (C, D) bf16, b_ref: (1, D) f32 -> o_ref: (TN, D) bf16
    acc = jnp.dot(x_ref[...], w_ref[...], preferred_element_type=jnp.float32)
    o_ref[...] = (acc + b_ref[...]).astype(o_ref.dtype)


def conv1x1_nhwc(x_nhwc, w, b, *, budget=None):
    """nn.Conv2d(c, d, kernel_size=1) on an NHWC bf16 input, via Pallas.

    `w` is (C_in, D) bf16.  NOTE: a real PyTorch Conv2d checkpoint stores the
    weight as (D, C_in, 1, 1) and must be squeezed+transposed when loading.
    """
    B, H, W, C = x_nhwc.shape
    D = w.shape[1]
    N = B * H * W
    vmem_limit, max_rows = budget if budget is not None else _tpu_budget()
    tile_n = _choose_tile(N, max_rows)
    x = x_nhwc.reshape(N, C)

    out = pl.pallas_call(
        _conv1x1_kernel,
        out_shape=jax.ShapeDtypeStruct((N, D), MATMUL_DTYPE),
        grid_spec=pltpu.PrefetchScalarGridSpec(
            num_scalar_prefetch=0,
            grid=(_cdiv(N, tile_n),),          # tail rows handled by block masking
            in_specs=[
                pl.BlockSpec((tile_n, C), lambda i: (i, 0)),   # activations, tiled
                pl.BlockSpec((C, D), lambda i: (0, 0)),        # weight stays resident
                pl.BlockSpec((1, D), lambda i: (0, 0)),        # bias stays resident
            ],
            out_specs=pl.BlockSpec((tile_n, D), lambda i: (i, 0)),
        ),
        compiler_params=pltpu.CompilerParams(
            dimension_semantics=("parallel",),
            vmem_limit_bytes=vmem_limit,
        ),
    )(x, w, b.reshape(1, D))
    return out.reshape(B, H, W, D)


# ----------------------------------------------------------------------------
# Pallas kernel 2: detection heads
#   class_embed:  Linear(D, 1)   -> pre-padded to a (D, 128) slab, logit at lane 0
#   bbox_embed:   MLP(D, D, 3, num_layers=3) with ReLU between layers
#                 layer-3 weight pre-padded to (D, 128), coords at lanes 1..3
#   then F.normalize(p=2, dim=-1) and sign flip on the last coordinate.
# Output is a single lane-dense (tile_n, 128) block:
#   col 0 = logits, cols 1..3 = coords, cols 4..127 = zero.
# ----------------------------------------------------------------------------
def _head_kernel(hs_ref, wc_ref, bc_ref, w1_ref, b1_ref, w2_ref, b2_ref,
                 w3_ref, b3_ref, out_ref):
    hs = hs_ref[...]                                              # (TN, D) bf16

    # Class head: lane-dense (TN, 128), logit in lane 0, zeros elsewhere.
    logits = jnp.dot(hs, wc_ref[...],
                     preferred_element_type=jnp.float32) + bc_ref[...]

    # 3-layer bbox MLP; ReLU/bias in f32, operands recast to bf16 for the MXU.
    h = jnp.maximum(
        jnp.dot(hs, w1_ref[...], preferred_element_type=jnp.float32)
        + b1_ref[...], 0.0)
    h = jnp.maximum(
        jnp.dot(h.astype(MATMUL_DTYPE), w2_ref[...],
                preferred_element_type=jnp.float32) + b2_ref[...], 0.0)
    c = jnp.dot(h.astype(MATMUL_DTYPE), w3_ref[...],
                preferred_element_type=jnp.float32) + b3_ref[...]  # (TN, 128)

    # F.normalize(p=2, dim=-1, eps=1e-12): zero-padded lanes contribute nothing
    # to the sum of squares, so reduce over all 128 lanes directly.
    sumsq = jnp.sum(c * c, axis=-1, keepdims=True)
    inv = lax.rsqrt(jnp.maximum(sumsq, 1e-24))                     # EUP path
    c = c * inv
    # outputs_coord * ((outputs_coord[..., -1:] > 0) * 2 - 1); last coord = lane 3
    sign = (c[:, 3:4] > 0).astype(jnp.float32) * 2.0 - 1.0
    c = c * sign

    # Merge: logits slab is zero outside lane 0, coord slab zero outside 1..3.
    out_ref[...] = (logits + c).astype(out_ref.dtype)


def detr_heads(hs, params, *, budget=None):
    """hs: (L, B, Q, D) f32 -> (logits (L,B,Q,1), coords (L,B,Q,3)) f32."""
    L, B, Q, D = hs.shape
    N = L * B * Q
    vmem_limit, max_rows = budget if budget is not None else _tpu_budget()
    tile_n = _choose_tile(N, max_rows)
    hs2 = hs.reshape(N, D).astype(MATMUL_DTYPE)      # single cast at JAX level

    const = lambda r, c: pl.BlockSpec((r, c), lambda i: (0, 0))
    out = pl.pallas_call(
        _head_kernel,
        out_shape=jax.ShapeDtypeStruct((N, 128), jnp.float32),
        grid_spec=pltpu.PrefetchScalarGridSpec(
            num_scalar_prefetch=0,
            grid=(_cdiv(N, tile_n),),
            in_specs=[
                pl.BlockSpec((tile_n, D), lambda i: (i, 0)),   # hs, tiled over rows
                const(D, 128), const(1, 128),                  # class head (lane 0)
                const(D, D), const(1, D),                      # bbox layer 1
                const(D, D), const(1, D),                      # bbox layer 2
                const(D, 128), const(1, 128),                  # bbox layer 3 (lanes 1..3)
            ],
            out_specs=pl.BlockSpec((tile_n, 128), lambda i: (i, 0)),
        ),
        compiler_params=pltpu.CompilerParams(
            dimension_semantics=("parallel",),
            vmem_limit_bytes=vmem_limit,
        ),
    )(hs2, params["wc128"], params["bc128"], params["w1"], params["b1"],
      params["w2"], params["b2"], params["w3_128"], params["b3_128"])

    logits = out[:, 0:1].reshape(L, B, Q, 1)
    coord = out[:, 1:4].reshape(L, B, Q, 3)
    return logits, coord


# ----------------------------------------------------------------------------
# External-module stubs (plain-JAX glue, deterministic, channels-last)
# ----------------------------------------------------------------------------
def sine_pe(B, D, H, W):
    # Standard DETR-style sine positional encoding -> (B, H, W, D) (NHWC), f32.
    yy, xx = jnp.meshgrid(jnp.arange(H, dtype=jnp.float32),
                          jnp.arange(W, dtype=jnp.float32), indexing="ij")
    half = D // 2
    dim_t = 10000.0 ** (2.0 * (jnp.arange(half) // 2).astype(jnp.float32) / half)
    px = xx[..., None] / dim_t                                   # (H, W, half)
    py = yy[..., None] / dim_t
    px = jnp.concatenate([jnp.sin(px[..., 0::2]), jnp.cos(px[..., 1::2])], -1)
    py = jnp.concatenate([jnp.sin(py[..., 0::2]), jnp.cos(py[..., 1::2])], -1)
    pos = jnp.concatenate([py, px], axis=-1)                     # (H, W, D)
    return jnp.broadcast_to(pos[None], (B, H, W, D))


def transformer_stub(src, query_embed, pos, num_layers=2):
    # TODO(synk): the real DETR Transformer is an external module
    # (transformer.py, not provided); stubbed with a deterministic pooled
    # mixing so the downstream Pallas head kernels see a realistic `hs`.
    B, H, W, D = src.shape
    mem = (src.astype(jnp.float32) + pos).reshape(B, H * W, D).mean(axis=1)
    Q = query_embed.shape[0]
    h = jnp.broadcast_to(query_embed[None], (B, Q, D)) + mem[:, None, :]
    layers = []
    for l in range(num_layers):
        h = jnp.tanh(h * (0.5 + 0.25 * l))
        layers.append(h)
    return jnp.stack(layers, axis=0)                             # (L, B, Q, D) f32


# ----------------------------------------------------------------------------
# VPTR forward (aux_loss=False path)
# ----------------------------------------------------------------------------
def vptr_forward(inp, params):
    x = inp[0]                                                   # (B, C, H, W) f32
    # Single NCHW->NHWC transpose + single bf16 cast at model entry; everything
    # downstream (conv1x1, heads) stays channels-last / bf16-operand.
    x_nhwc = jnp.transpose(x, (0, 2, 3, 1)).astype(MATMUL_DTYPE)
    # TODO(synk): backbone is an external module (backbone.py not provided);
    # stubbed as identity returning one feature level with num_channels=[C].
    features = [x_nhwc]
    srcs = [conv1x1_nhwc(f, params["proj_w"][i], params["proj_b"][i])
            for i, f in enumerate(features)]                     # NHWC bf16
    pos = [sine_pe(s.shape[0], s.shape[3], s.shape[1], s.shape[2]) for s in srcs]
    hs = transformer_stub(srcs[0], params["query_embed"], pos[0])
    outputs_class, outputs_coord = detr_heads(hs, params)
    return {"pred_logits": outputs_class[-1], "pred_pos": outputs_coord[-1]}


def init_params(key, c_in, d, num_queries):
    ks = jax.random.split(key, 11)
    s = 0.05
    n = lambda k, shp: jax.random.normal(k, shp, jnp.float32) * s
    wc = n(ks[3], (d, 1))   # class_embed weight (in, out) layout
    bc = n(ks[4], (1, 1))
    w3 = n(ks[9], (d, 3))   # bbox_embed.layers[2]
    b3 = n(ks[10], (1, 3))
    return {
        # Weights live in HBM as bf16 (halves weight DMA); biases stay f32.
        # NOTE: real PyTorch checkpoints store Conv2d/Linear weights as
        # (out, in[,1,1]); they must be transposed to (in, out) when loading.
        "proj_w": [n(ks[0], (c_in, d)).astype(MATMUL_DTYPE)],    # input_proj[0]
        "proj_b": [n(ks[1], (d,))],
        "query_embed": jax.random.normal(ks[2], (num_queries, d), jnp.float32),
        # class head padded to lane 0 of a 128-wide slab; bbox layer 3 padded to
        # lanes 1..3 -> head kernel stores one dense 128-lane block, no concat.
        "wc128": jnp.pad(wc, ((0, 0), (0, 127))).astype(MATMUL_DTYPE),
        "bc128": jnp.pad(bc, ((0, 0), (0, 127))),
        "w1": n(ks[5], (d, d)).astype(MATMUL_DTYPE), "b1": n(ks[6], (1, d)),
        "w2": n(ks[7], (d, d)).astype(MATMUL_DTYPE), "b2": n(ks[8], (1, d)),
        "w3_128": jnp.pad(w3, ((0, 0), (1, 124))).astype(MATMUL_DTYPE),
        "b3_128": jnp.pad(b3, ((0, 0), (1, 124))),
    }


if __name__ == "__main__":
    key = jax.random.PRNGKey(0)
    kx, kp = jax.random.split(key)
    B, C, H, W = 2, 4, 16, 16          # small NCHW image-like input
    D, Q = 32, 8                       # hidden_dim, num_queries
    x = jax.random.normal(kx, (B, C, H, W), jnp.float32)
    params = init_params(kp, C, D, Q)

    out = vptr_forward((x,), params)
    jax.block_until_ready(out)

    assert out["pred_logits"].shape == (B, Q, 1)
    assert out["pred_pos"].shape == (B, Q, 3)
    # pred_pos rows are unit-norm with non-negative last coordinate (sign flip)
    nrm = jnp.linalg.norm(out["pred_pos"], axis=-1)
    assert bool(jnp.all(jnp.abs(nrm - 1.0) < 1e-3))
    assert bool(jnp.all(out["pred_pos"][..., -1] >= 0.0))
    print("KERNEL_OK")
</pallas_src>

<mosaic_0001>
module attributes {stable_mosaic.version = 11 : i64} {
  func.func @_conv1x1_kernel(%arg0: i32, %arg1: memref<256x4xbf16, #tpu.memory_space<vmem>>, %arg2: memref<4x32xbf16, #tpu.memory_space<vmem>>, %arg3: memref<1x32xf32, #tpu.memory_space<vmem>>, %arg4: memref<256x32xbf16, #tpu.memory_space<vmem>>) attributes {dimension_semantics = [#tpu.dimension_semantics<parallel>], iteration_bounds = array<i64: 2>, scalar_prefetch = 0 : i64, scratch_operands = 0 : i64, tpu.core_type = #tpu.core_type<tc>, window_params = [{transform_indices = @transform_0, window_bounds = array<i64: 256, 4>}, {pipeline_mode = #tpu.pipeline_mode<synchronous>, transform_indices = @transform_1, window_bounds = array<i64: 4, 32>}, {pipeline_mode = #tpu.pipeline_mode<synchronous>, transform_indices = @transform_2, window_bounds = array<i64: 1, 32>}, {transform_indices = @transform_3, window_bounds = array<i64: 256, 32>}]} {
    %c0 = arith.constant 0 : index
    %c0_0 = arith.constant 0 : index
    %0 = vector.load %arg1[%c0, %c0_0] : memref<256x4xbf16, #tpu.memory_space<vmem>>, vector<256x4xbf16>
    %c0_1 = arith.constant 0 : index
    %c0_2 = arith.constant 0 : index
    %1 = vector.load %arg2[%c0_1, %c0_2] : memref<4x32xbf16, #tpu.memory_space<vmem>>, vector<4x32xbf16>
    %cst = arith.constant dense<0.000000e+00> : vector<256x32xf32>
    %2 = tpu.matmul %0, %1, %cst {dimension_numbers = #tpu.dot_dimension_numbers<[1], [0], [0], [1], [0, 0, 1, 1], [], []>} : vector<256x4xbf16>, vector<4x32xbf16>, vector<256x32xf32> -> vector<256x32xf32>
    %c0_3 = arith.constant 0 : index
    %c0_4 = arith.constant 0 : index
    %3 = vector.load %arg3[%c0_3, %c0_4] : memref<1x32xf32, #tpu.memory_space<vmem>>, vector<1x32xf32>
    %4 = vector.broadcast %3 : vector<1x32xf32> to vector<256x32xf32>
    %5 = arith.addf %2, %4 : vector<256x32xf32>
    %6 = arith.truncf %5 : vector<256x32xf32> to vector<256x32xbf16>
    %c0_5 = arith.constant 0 : index
    %c0_6 = arith.constant 0 : index
    %7 = vector.load %arg4[%c0_5, %c0_6] : memref<256x32xbf16, #tpu.memory_space<vmem>>, vector<256x32xbf16>
    tpu.vector_store %arg4[%c0_5, %c0_6], %6 {strides = array<i32>} : memref<256x32xbf16, #tpu.memory_space<vmem>>, vector<256x32xbf16>,
    return
  }
  func.func @transform_0(%arg0: i32) -> (i32, i32) {
    %c0_i32 = arith.constant 0 : i32
    %c0_i32_0 = arith.constant 0 : i32
    return %arg0, %c0_i32 : i32, i32
  }
  func.func @transform_1(%arg0: i32) -> (i32, i32) {
    %c0_i32 = arith.constant 0 : i32
    %c0_i32_0 = arith.constant 0 : i32
    %c0_i32_1 = arith.constant 0 : i32
    return %c0_i32, %c0_i32_0 : i32, i32
  }
  func.func @transform_2(%arg0: i32) -> (i32, i32) {
    %c0_i32 = arith.constant 0 : i32
    %c0_i32_0 = arith.constant 0 : i32
    %c0_i32_1 = arith.constant 0 : i32
    return %c0_i32, %c0_i32_0 : i32, i32
  }
  func.func @transform_3(%arg0: i32) -> (i32, i32) {
    %c0_i32 = arith.constant 0 : i32
    %c0_i32_0 = arith.constant 0 : i32
    return %arg0, %c0_i32 : i32, i32
  }
}

</mosaic_0001>

<bundles_post_ra>
// kernel: tpu_custom_call.1
= control target key start
LH: loop header
LB: loop body
LE: loop exit
PB: predicated region body
PF: predicated region fallthrough
CT: control target
= control target key end

     0   :  { %s702_s12 = smov 0   ;;  %s848_s0 = inlined_call_operand.vmem [shape: bf16[512,4], index: 0, kind: input, shape index: {}]   ;;  %s849_s1 = inlined_call_operand.vmem [shape: bf16[4,32], index: 1, kind: input, shape index: {}]   ;;  %s850_s2 = inlined_call_operand.vmem [shape: f32[1,32], index: 2, kind: input, shape index: {}]   ;;  %s851_s3 = inlined_call_operand.vmem [shape: bf16[512,32], index: 3, kind: output, shape index: {}]  }
   0x1 LB: > { %s555_s13 = sadd.s32 4294967295, %s680_s12   ;;  %p559_p0 = scmp.ge.s32.totalorder %s680_s12, 1  ;;  %s680_s12 = sphi %s702_s12, %s13_s12  }
   0x2   : > { %p138_p1 = scmp.lt.s32.totalorder %s680_s12, 3 }
   0x4   : > { %p139_p2 = pnand %p559_p0, %p138_p1 }
   0x5   : > { %s560_s16 = sshll.u32 (!%p139_p2), %s555_s13, 5 }
   0x6   : > { %142 = sbr.rel (%p139_p2) target bundleno = 211 (0xd3), region = 32  ;;  %p163_p3 = scmp.lt.s32.totalorder (!%p139_p2), %s560_s16, 63 }
   0xb   : > { %v207_v0 = vld [vmem:[%s849_s1] sm:$0x3]  ;;  %vm341_vm0 = vcmask 1041408   ;;  %s853_s16 = smov (!%p163_p3, %s560_s16), 63  ;;  %vm292_vm1 = vcmask 31744   ;;  %vm466_vm2 = vcmask 257024  }
   0xc   : > { %v343_v1 = vsel %vm341_vm0, %v207_v0, 0  ;;  %s561_s17 = sshll.u32 %s853_s16, 2  ;;  %v740_v18 = vld [vmem:[%s850_s2] ss:$0 sm:$0xff] }
   0xd   : > { %352 = vmatpush.bf16.msra.mxu0 %v343_v1  ;;  %662 = vmatpush.bf16.msra.mxu1 %v343_v1  ;;  %s166_s20 = scalar_lea.vmem %s848_s0, %s561_s17  ;;  %s749_s25 = scalar_lea.vmem %s851_s3, %s561_s17 }
   0xe   : > { %663 = vmatpush.bf16.msra.mxu2 %v343_v1  ;;  %664 = vmatpush.bf16.msra.mxu3 %v343_v1  ;;  %v646_v2 = vld [vmem:[%s166_s20] sm:$0xff]  ;;  %v647_v6 = vld [vmem:[%s166_s20 + $0x8] sm:$0xff]  ;;  %v648_v10 = vld [vmem:[%s166_s20 + $0x10] sm:$0xff] }
   0xf   : > { %v650_v3 = vld [vmem:[%s166_s20 + $0x20] sm:$0xff]  ;;  %v651_v7 = vld [vmem:[%s166_s20 + $0x28] sm:$0xff]  ;;  %v652_v11 = vld [vmem:[%s166_s20 + $0x30] sm:$0xff] }
  0x10   : > { %v654_v4 = vld [vmem:[%s166_s20 + $0x40] sm:$0xff]  ;;  %628 = vmatmul.msk.bf16.vlgmr.msra.gmra.mxu0 %vm292_vm1, %v646_v2  ;;  %632 = vmatmul.msk.bf16.vlgmr.msra.gmra.mxu1 %vm292_vm1, %v650_v3  ;;  %v655_v8 = vld [vmem:[%s166_s20 + $0x48] sm:$0xff]  ;;  %v656_v12 = vld [vmem:[%s166_s20 + $0x50] sm:$0xff] }
  0x11   : > { %v658_v5 = vld [vmem:[%s166_s20 + $0x60] sm:$0xff]  ;;  %636 = vmatmul.msk.bf16.vlgmr.msra.gmra.mxu2 %vm292_vm1, %v654_v4  ;;  %v659_v9 = vld [vmem:[%s166_s20 + $0x68] sm:$0xff]  ;;  %v660_v13 = vld [vmem:[%s166_s20 + $0x70] sm:$0xff] }
  0x12   : > { %640 = vmatmul.msk.bf16.vlgmr.msra.gmra.mxu3 %vm292_vm1, %v658_v5  ;;  %v649_v14 = vld [vmem:[%s166_s20 + $0x18] sm:$0xff] }
  0x13   : > { %v653_v15 = vld [vmem:[%s166_s20 + $0x38] sm:$0xff] }
  0x14   : > { %v657_v16 = vld [vmem:[%s166_s20 + $0x58] sm:$0xff] }
  0x15   : > { %v661_v17 = vld [vmem:[%s166_s20 + $0x78] sm:$0xff] }
  0x20   : > { %629 = vmatmul.msk.bf16.gmra.mxu0 %vm292_vm1, %v647_v6  ;;  %633 = vmatmul.msk.bf16.gmra.mxu1 %vm292_vm1, %v651_v7 }
  0x21   : > { %637 = vmatmul.msk.bf16.gmra.mxu2 %vm292_vm1, %v655_v8 }
  0x22   : > { %641 = vmatmul.msk.bf16.gmra.mxu3 %vm292_vm1, %v659_v9 }
  0x30   : > { %630 = vmatmul.msk.bf16.gmra.mxu0 %vm292_vm1, %v648_v10  ;;  %634 = vmatmul.msk.bf16.gmra.mxu1 %vm292_vm1, %v652_v11 }
  0x31   : > { %638 = vmatmul.msk.bf16.gmra.mxu2 %vm292_vm1, %v656_v12 }
  0x32   : > { %642 = vmatmul.msk.bf16.gmra.mxu3 %vm292_vm1, %v660_v13 }
  0x40   : > { %631 = vmatmul.msk.bf16.gmra.mxu0 %vm292_vm1, %v649_v14  ;;  %635 = vmatmul.msk.bf16.gmra.mxu1 %vm292_vm1, %v653_v15 }
  0x41   : > { %639 = vmatmul.msk.bf16.gmra.mxu2 %vm292_vm1, %v657_v16 }
  0x42   : > { %643 = vmatmul.msk.bf16.gmra.mxu3 %vm292_vm1, %v661_v17 }
  0x8d   : > { %v354_v19 = vpop.f32.mrf.mxu0  ;;  %v374_v20 = vpop.f32.mrf.mxu1 }
  0x8e   : > { %v355_v21 = vadd.f32 %v740_v18, %v354_v19  ;;  %v375_v22 = vadd.f32 %v740_v18, %v374_v20 }
  0x90   : > { %v434_v23 = vpack.c.bf16 %v355_v21, %v355_v21  ;;  %v442_v24 = vpack.c.bf16 %v375_v22, %v375_v22 }
  0x92   : > { %467 = vst.msk [vmem:[%s749_s25] sm:$0xf] %vm466_vm2, %v434_v23 }
  0x93   : > { %475 = vst.msk [vmem:[%s749_s25 + $0x20] sm:$0xf] %vm466_vm2, %v442_v24 }
  0x94   : > { %v394_v25 = vpop.f32.mrf.mxu2 }
  0x95   : > { %v414_v26 = vpop.f32.mrf.mxu3  ;;  %v395_v27 = vadd.f32 %v740_v18, %v394_v25  ;;  %v356_v29 = vpop.f32.mrf.mxu0 }
  0x96   : > { %v415_v28 = vadd.f32 %v740_v18, %v414_v26  ;;  %v376_v30 = vpop.f32.mrf.mxu1  ;;  %v357_v31 = vadd.f32 %v740_v18, %v356_v29 }
  0x97   : > { %v377_v32 = vadd.f32 %v740_v18, %v376_v30  ;;  %v450_v33 = vpack.c.bf16 %v395_v27, %v395_v27 }
  0x98   : > { %v458_v34 = vpack.c.bf16 %v415_v28, %v415_v28  ;;  %v435_v35 = vpack.c.bf16 %v357_v31, %v357_v31 }
  0x99   : > { %v443_v36 = vpack.c.bf16 %v377_v32, %v377_v32  ;;  %483 = vst.msk [vmem:[%s749_s25 + $0x40] sm:$0xf] %vm466_vm2, %v450_v33 }
  0x9a   : > { %491 = vst.msk [vmem:[%s749_s25 + $0x60] sm:$0xf] %vm466_vm2, %v458_v34 }
  0x9b   : > { %468 = vst.msk [vmem:[%s749_s25 + $0x4] sm:$0xf] %vm466_vm2, %v435_v35 }
  0x9c   : > { %476 = vst.msk [vmem:[%s749_s25 + $0x24] sm:$0xf] %vm466_vm2, %v443_v36  ;;  %v396_v37 = vpop.f32.mrf.mxu2 }
  0x9d   : > { %v416_v38 = vpop.f32.mrf.mxu3  ;;  %v397_v39 = vadd.f32 %v740_v18, %v396_v37  ;;  %v359_v41 = vpop.f32.mrf.mxu0 }
  0x9e   : > { %v417_v40 = vadd.f32 %v740_v18, %v416_v38  ;;  %v379_v42 = vpop.f32.mrf.mxu1  ;;  %v360_v43 = vadd.f32 %v740_v18, %v359_v41 }
  0x9f   : > { %v380_v44 = vadd.f32 %v740_v18, %v379_v42  ;;  %v451_v45 = vpack.c.bf16 %v397_v39, %v397_v39 }
  0xa0   : > { %v459_v46 = vpack.c.bf16 %v417_v40, %v417_v40  ;;  %v436_v47 = vpack.c.bf16 %v360_v43, %v360_v43 }
  0xa1   : > { %v444_v48 = vpack.c.bf16 %v380_v44, %v380_v44  ;;  %484 = vst.msk [vmem:[%s749_s25 + $0x44] sm:$0xf] %vm466_vm2, %v451_v45 }
  0xa2   : > { %492 = vst.msk [vmem:[%s749_s25 + $0x64] sm:$0xf] %vm466_vm2, %v459_v46 }
  0xa3   : > { %469 = vst.msk [vmem:[%s749_s25 + $0x8] sm:$0xf] %vm466_vm2, %v436_v47 }
  0xa4   : > { %477 = vst.msk [vmem:[%s749_s25 + $0x28] sm:$0xf] %vm466_vm2, %v444_v48  ;;  %v399_v49 = vpop.f32.mrf.mxu2 }
  0xa5   : > { %v419_v50 = vpop.f32.mrf.mxu3  ;;  %v400_v51 = vadd.f32 %v740_v18, %v399_v49  ;;  %v361_v53 = vpop.f32.mrf.mxu0 }
  0xa6   : > { %v420_v52 = vadd.f32 %v740_v18, %v419_v50  ;;  %v381_v54 = vpop.f32.mrf.mxu1  ;;  %v362_v55 = vadd.f32 %v740_v18, %v361_v53 }
  0xa7   : > { %v382_v56 = vadd.f32 %v740_v18, %v381_v54  ;;  %v452_v57 = vpack.c.bf16 %v400_v51, %v400_v51 }
  0xa8   : > { %v460_v58 = vpack.c.bf16 %v420_v52, %v420_v52  ;;  %v437_v59 = vpack.c.bf16 %v362_v55, %v362_v55 }
  0xa9   : > { %v445_v60 = vpack.c.bf16 %v382_v56, %v382_v56  ;;  %485 = vst.msk [vmem:[%s749_s25 + $0x48] sm:$0xf] %vm466_vm2, %v452_v57 }
  0xaa   : > { %493 = vst.msk [vmem:[%s749_s25 + $0x68] sm:$0xf] %vm466_vm2, %v460_v58 }
  0xab   : > { %470 = vst.msk [vmem:[%s749_s25 + $0xc] sm:$0xf] %vm466_vm2, %v437_v59 }
  0xac   : > { %478 = vst.msk [vmem:[%s749_s25 + $0x2c] sm:$0xf] %vm466_vm2, %v445_v60  ;;  %v401_v61 = vpop.f32.mrf.mxu2 }
  0xad   : > { %v421_v62 = vpop.f32.mrf.mxu3  ;;  %v402_v63 = vadd.f32 %v740_v18, %v401_v61  ;;  %v364_v1 = vpop.f32.mrf.mxu0 }
  0xae   : > { %v422_v0 = vadd.f32 %v740_v18, %v421_v62  ;;  %v384_v2 = vpop.f32.mrf.mxu1  ;;  %v365_v3 = vadd.f32 %v740_v18, %v364_v1 }
  0xaf   : > { %v385_v4 = vadd.f32 %v740_v18, %v384_v2  ;;  %v453_v5 = vpack.c.bf16 %v402_v63, %v402_v63 }
  0xb0   : > { %v461_v6 = vpack.c.bf16 %v422_v0, %v422_v0  ;;  %v438_v7 = vpack.c.bf16 %v365_v3, %v365_v3 }
  0xb1   : > { %v446_v8 = vpack.c.bf16 %v385_v4, %v385_v4  ;;  %486 = vst.msk [vmem:[%s749_s25 + $0x4c] sm:$0xf] %vm466_vm2, %v453_v5 }
  0xb2   : > { %494 = vst.msk [vmem:[%s749_s25 + $0x6c] sm:$0xf] %vm466_vm2, %v461_v6 }
  0xb3   : > { %471 = vst.msk [vmem:[%s749_s25 + $0x10] sm:$0xf] %vm466_vm2, %v438_v7 }
  0xb4   : > { %479 = vst.msk [vmem:[%s749_s25 + $0x30] sm:$0xf] %vm466_vm2, %v446_v8  ;;  %v404_v9 = vpop.f32.mrf.mxu2 }
  0xb5   : > { %v424_v10 = vpop.f32.mrf.mxu3  ;;  %v405_v11 = vadd.f32 %v740_v18, %v404_v9  ;;  %v366_v13 = vpop.f32.mrf.mxu0 }
  0xb6   : > { %v425_v12 = vadd.f32 %v740_v18, %v424_v10  ;;  %v386_v14 = vpop.f32.mrf.mxu1  ;;  %v367_v15 = vadd.f32 %v740_v18, %v366_v13 }
  0xb7   : > { %v387_v16 = vadd.f32 %v740_v18, %v386_v14  ;;  %v454_v17 = vpack.c.bf16 %v405_v11, %v405_v11 }
  0xb8   : > { %v462_v19 = vpack.c.bf16 %v425_v12, %v425_v12  ;;  %v439_v20 = vpack.c.bf16 %v367_v15, %v367_v15 }
  0xb9   : > { %v447_v21 = vpack.c.bf16 %v387_v16, %v387_v16  ;;  %487 = vst.msk [vmem:[%s749_s25 + $0x50] sm:$0xf] %vm466_vm2, %v454_v17 }
  0xba   : > { %495 = vst.msk [vmem:[%s749_s25 + $0x70] sm:$0xf] %vm466_vm2, %v462_v19 }
  0xbb   : > { %472 = vst.msk [vmem:[%s749_s25 + $0x14] sm:$0xf] %vm466_vm2, %v439_v20 }
  0xbc   : > { %480 = vst.msk [vmem:[%s749_s25 + $0x34] sm:$0xf] %vm466_vm2, %v447_v21  ;;  %v406_v22 = vpop.f32.mrf.mxu2 }
  0xbd   : > { %v426_v23 = vpop.f32.mrf.mxu3  ;;  %v407_v24 = vadd.f32 %v740_v18, %v406_v22  ;;  %v369_v26 = vpop.f32.mrf.mxu0 }
  0xbe   : > { %v427_v25 = vadd.f32 %v740_v18, %v426_v23  ;;  %v389_v27 = vpop.f32.mrf.mxu1  ;;  %v370_v28 = vadd.f32 %v740_v18, %v369_v26 }
  0xbf   : > { %v390_v29 = vadd.f32 %v740_v18, %v389_v27  ;;  %v455_v30 = vpack.c.bf16 %v407_v24, %v407_v24 }
  0xc0   : > { %v463_v31 = vpack.c.bf16 %v427_v25, %v427_v25  ;;  %v440_v32 = vpack.c.bf16 %v370_v28, %v370_v28 }
  0xc1   : > { %v448_v33 = vpack.c.bf16 %v390_v29, %v390_v29  ;;  %488 = vst.msk [vmem:[%s749_s25 + $0x54] sm:$0xf] %vm466_vm2, %v455_v30 }
  0xc2   : > { %496 = vst.msk [vmem:[%s749_s25 + $0x74] sm:$0xf] %vm466_vm2, %v463_v31 }
  0xc3   : > { %473 = vst.msk [vmem:[%s749_s25 + $0x18] sm:$0xf] %vm466_vm2, %v440_v32 }
  0xc4   : > { %481 = vst.msk [vmem:[%s749_s25 + $0x38] sm:$0xf] %vm466_vm2, %v448_v33  ;;  %v409_v34 = vpop.f32.mrf.mxu2 }
  0xc5   : > { %v429_v35 = vpop.f32.mrf.mxu3  ;;  %v410_v36 = vadd.f32 %v740_v18, %v409_v34  ;;  %v371_v38 = vpop.f32.mrf.mxu0 }
  0xc6   : > { %v430_v37 = vadd.f32 %v740_v18, %v429_v35  ;;  %v391_v39 = vpop.f32.mrf.mxu1  ;;  %v372_v40 = vadd.f32 %v740_v18, %v371_v38 }
  0xc7   : > { %v392_v41 = vadd.f32 %v740_v18, %v391_v39  ;;  %v456_v42 = vpack.c.bf16 %v410_v36, %v410_v36 }
  0xc8   : > { %v464_v43 = vpack.c.bf16 %v430_v37, %v430_v37  ;;  %v441_v44 = vpack.c.bf16 %v372_v40, %v372_v40 }
  0xc9   : > { %v449_v45 = vpack.c.bf16 %v392_v41, %v392_v41  ;;  %489 = vst.msk [vmem:[%s749_s25 + $0x58] sm:$0xf] %vm466_vm2, %v456_v42 }
  0xca   : > { %497 = vst.msk [vmem:[%s749_s25 + $0x78] sm:$0xf] %vm466_vm2, %v464_v43 }
  0xcb   : > { %474 = vst.msk [vmem:[%s749_s25 + $0x1c] sm:$0xf] %vm466_vm2, %v441_v44 }
  0xcc   : > { %482 = vst.msk [vmem:[%s749_s25 + $0x3c] sm:$0xf] %vm466_vm2, %v449_v45  ;;  %v411_v46 = vpop.f32.mrf.mxu2 }
  0xcd   : > { %v431_v47 = vpop.f32.mrf.mxu3  ;;  %v412_v48 = vadd.f32 %v740_v18, %v411_v46 }
  0xce   : > { %v432_v49 = vadd.f32 %v740_v18, %v431_v47 }
  0xcf   : > { %v457_v50 = vpack.c.bf16 %v412_v48, %v412_v48 }
  0xd0   : > { %v465_v51 = vpack.c.bf16 %v432_v49, %v432_v49 }
  0xd1   : > { %490 = vst.msk [vmem:[%s749_s25 + $0x5c] sm:$0xf] %vm466_vm2, %v457_v50 }
  0xd2   : > { %498 = vst.msk [vmem:[%s749_s25 + $0x7c] sm:$0xf] %vm466_vm2, %v465_v51 }
  0xd3 PF: > { %s13_s12 = sadd.s32 1, %s680_s12  }
  0xd4   : > { %p10_p4 = scmp.ge.s32.totalorder %s13_s12, 4  }
  0xd6   :  { %12 = sbr.rel (!%p10_p4) target bundleno = 1 (0x1), region = 62 }

</bundles_post_ra>
